<compile_context>
chip_gen: v7x
topology: tpu7x:2x2x1
jax: 0.10.0
libtpu: 0.0.40
codegen_flags: <defaults>
</compile_context>

<pallas_src>
import jax
import jax.numpy as jnp
from jax.experimental import pallas as pl
from jax.experimental.pallas import tpu as pltpu


def _round_up(x, m):
    return ((x + m - 1) // m) * m


def _pad_cast(x, shape, dtype):
    """Cast + zero-pad to `shape` in one fused XLA op; no-op when aligned."""
    x = x.astype(dtype)
    pads = tuple((0, t - s) for s, t in zip(x.shape, shape))
    if any(hi for _, hi in pads):
        x = jnp.pad(x, pads)
    return x


# ---------------------------------------------------------------------------
# Stage 1: projection  seq_fts = seq @ W   (computed once per node, bf16 out)
# ---------------------------------------------------------------------------
def _proj_kernel(seq_ref, w_ref, out_ref):
    # seq_ref: (TP, Fin_p) bf16, w_ref: (Fin_p, Fout_p) bf16 (resident),
    # out_ref: (TP, Fout_p) bf16
    out_ref[...] = jnp.dot(
        seq_ref[...], w_ref[...], preferred_element_type=jnp.float32
    ).astype(out_ref.dtype)


def _project(seq_p, w_p, *, tile_p, vmem_limit):
    B, Np, Fin_p = seq_p.shape
    Fout_p = w_p.shape[1]
    return pl.pallas_call(
        _proj_kernel,
        out_shape=jax.ShapeDtypeStruct((B, Np, Fout_p), seq_p.dtype),
        grid_spec=pltpu.PrefetchScalarGridSpec(
            num_scalar_prefetch=0,
            grid=(B, Np // tile_p),
            in_specs=[
                pl.BlockSpec((pl.Squeezed(), tile_p, Fin_p),
                             lambda b, i: (b, i, 0)),
                # W: resident, same block every step
                pl.BlockSpec((Fin_p, Fout_p), lambda b, i: (0, 0)),
            ],
            out_specs=pl.BlockSpec((pl.Squeezed(), tile_p, Fout_p),
                                   lambda b, i: (b, i, 0)),
        ),
        compiler_params=pltpu.CompilerParams(
            dimension_semantics=("parallel", "parallel"),
            vmem_limit_bytes=vmem_limit,
        ),
    )(seq_p, w_p)


# ---------------------------------------------------------------------------
# Stage 2: out = PReLU(adj @ seq_fts + bias)
# ---------------------------------------------------------------------------
def _gcn_agg_kernel(fts_ref, adj_ref, bias_ref, alpha_ref, out_ref, acc_ref):
    # fts_ref:  (TK, Fout_p)  bf16 — k-tile of this batch's projected features
    # adj_ref:  (TM, TK)      bf16 — (row tile, k tile) of adjacency
    # bias_ref: (1, Fout_p)   f32  — resident
    # alpha_ref:(1, 1)        f32  — SMEM scalar (PReLU slope)
    # out_ref:  (TM, Fout_p)
    # acc_ref:  (TM, Fout_p)  f32 VMEM scratch accumulator
    k = pl.program_id(2)

    @pl.when(k == 0)
    def _():
        acc_ref[...] = jnp.zeros_like(acc_ref)

    acc_ref[...] += jnp.dot(adj_ref[...], fts_ref[...],
                            preferred_element_type=jnp.float32)

    @pl.when(k == pl.num_programs(2) - 1)
    def _():
        alpha = alpha_ref[0, 0]
        out = acc_ref[...] + bias_ref[...]          # (1,Fout)->(TM,Fout) broadcast
        out_ref[...] = jnp.where(out > 0, out, alpha * out).astype(out_ref.dtype)


def gcn_forward(seq, adj, du, w, bias, alpha, *, sparse=False,
                compute_dtype=jnp.bfloat16, out_dtype=jnp.float32):
    """Pallas GCN forward. `du` is unused (matches PyTorch module). Dense only."""
    del du
    assert not sparse, "sparse path not implemented"
    B, N, F_in = seq.shape
    F_out = w.shape[1]
    LANE = 128

    Fin_p = _round_up(F_in, LANE)
    Fout_p = _round_up(F_out, LANE)
    out_bytes = jnp.dtype(out_dtype).itemsize

    # ---- node-dimension tile selection ------------------------------------
    # Big tiles amortize per-grid-step overhead and the f32 accumulator RMW
    # (important on v5e's single vst slot / v6e overhead-bound regime).
    if N >= 1024:
        tile = 512
    elif N >= 512:
        tile = 256
    else:
        tile = 128
    # v7x has 2 TensorCores/chip: keep >=2 iterations on the parallel axes so
    # neither core idles (v5e/v6e single-TC are unaffected).
    while tile > 128 and B * (_round_up(N, tile) // tile) < 2:
        tile //= 2
    # VMEM budget is derived against v7x's 64 MiB/TC (scoped default 32 MiB),
    # the smallest of the three generations: keep the double-buffered
    # working set under ~24 MiB.
    def _agg_vmem_bytes(t):
        fts = t * Fout_p * 2                       # bf16 seq_fts tile
        adj_b = t * t * 2                          # bf16 adj tile
        out_b = t * Fout_p * out_bytes             # output tile
        acc = t * Fout_p * 4                       # f32 accumulator (single)
        return 2 * (fts + adj_b + out_b) + acc
    while tile > 128 and _agg_vmem_bytes(tile) > 24 * 1024 * 1024:
        tile //= 2

    Np = _round_up(N, tile)
    TM = TK = tile
    vmem_limit = 32 * 1024 * 1024

    # ---- pad + cast once (fused; no-op when already aligned) --------------
    # Zero padding keeps both reductions exact; padded rows/cols are sliced
    # off at the end.
    seq_p = _pad_cast(seq, (B, Np, Fin_p), compute_dtype)
    adj_p = _pad_cast(adj, (B, Np, Np), compute_dtype)
    w_p = _pad_cast(w, (Fin_p, Fout_p), compute_dtype)
    bias2d = _pad_cast(bias.reshape(1, F_out), (1, Fout_p), jnp.float32)
    alpha2d = jnp.asarray(alpha, jnp.float32).reshape(1, 1)

    # ---- stage 1: projection (hoisted out of the adjacency k-loop) --------
    seq_fts = _project(seq_p, w_p, tile_p=tile, vmem_limit=vmem_limit)

    # ---- stage 2: adjacency aggregation + bias + PReLU ---------------------
    grid = (B, Np // TM, Np // TK)
    out_padded = pl.pallas_call(
        _gcn_agg_kernel,
        out_shape=jax.ShapeDtypeStruct((B, Np, Fout_p), out_dtype),
        grid_spec=pltpu.PrefetchScalarGridSpec(
            num_scalar_prefetch=0,
            grid=grid,
            in_specs=[
                # seq_fts: (TK, F_out) block indexed by (batch, k tile)
                pl.BlockSpec((pl.Squeezed(), TK, Fout_p),
                             lambda b, i, k: (b, k, 0)),
                # adj: (TM, TK) block indexed by (batch, row tile, k tile)
                pl.BlockSpec((pl.Squeezed(), TM, TK),
                             lambda b, i, k: (b, i, k)),
                # bias: resident (1, F_out) row
                pl.BlockSpec((1, Fout_p), lambda b, i, k: (0, 0)),
                # alpha: scalar in SMEM (no per-step VMEM DMA)
                pl.BlockSpec(memory_space=pltpu.MemorySpace.SMEM),
            ],
            out_specs=pl.BlockSpec((pl.Squeezed(), TM, Fout_p),
                                   lambda b, i, k: (b, i, 0)),
            scratch_shapes=[pltpu.VMEM((TM, Fout_p), jnp.float32)],
        ),
        compiler_params=pltpu.CompilerParams(
            # B / row-tile axes are independent (megacore-shardable on v7x);
            # k is the reduction axis feeding the resident accumulator.
            dimension_semantics=("parallel", "parallel", "arbitrary"),
            vmem_limit_bytes=vmem_limit,
        ),
    )(seq_fts, adj_p, bias2d, alpha2d)

    if (Np, Fout_p) == (N, F_out):
        return out_padded
    return out_padded[:, :N, :F_out]


def gcn_reference(seq, adj, w, bias, alpha):
    seq_fts = jnp.einsum("bni,io->bno", seq.astype(jnp.float32),
                         w.astype(jnp.float32))
    out = jnp.einsum("bnm,bmo->bno", adj.astype(jnp.float32), seq_fts) + bias
    return jnp.where(out > 0, out, alpha * out)


if __name__ == "__main__":
    key = jax.random.PRNGKey(0)
    B, N, F_in, F_out = 2, 16, 32, 32

    k_seq, k_adj, k_w = jax.random.split(key, 3)
    seq = jax.random.normal(k_seq, (B, N, F_in), dtype=jnp.float32)
    adj = jax.random.uniform(k_adj, (B, N, N), dtype=jnp.float32)
    # row-normalize adjacency (typical GCN preprocessing; not required for semantics)
    adj = adj / jnp.sum(adj, axis=-1, keepdims=True)
    du = jnp.sum(adj, axis=-1)  # unused by forward, present for signature parity

    # Deterministic params matching nn.Linear(in_ft, out_ft, bias=False) with
    # xavier_uniform_, bias filled with 0, PReLU default alpha = 0.25.
    bound = jnp.sqrt(6.0 / (F_in + F_out))
    w = jax.random.uniform(k_w, (F_in, F_out), dtype=jnp.float32,
                           minval=-bound, maxval=bound)
    bias = jnp.zeros((F_out,), dtype=jnp.float32)
    alpha = jnp.float32(0.25)

    out = gcn_forward(seq, adj, du, w, bias, alpha)
    out = jax.block_until_ready(out)

    # Reference evaluated on the same bf16-cast operands the kernel consumes
    # (math in f32); the kernel additionally rounds seq_fts to bf16 before the
    # adjacency matmul, covered by the tolerance below.
    ref = gcn_reference(seq.astype(jnp.bfloat16), adj.astype(jnp.bfloat16),
                        w.astype(jnp.bfloat16), bias, alpha)
    assert out.shape == (B, N, F_out), out.shape
    max_err = float(jnp.max(jnp.abs(out - ref)))
    assert jnp.allclose(out, ref, atol=3e-2, rtol=3e-2), f"mismatch, max_err={max_err}"

    print("KERNEL_OK")
</pallas_src>

<mosaic_0001>
module attributes {stable_mosaic.version = 11 : i64} {
  func.func @_proj_kernel(%arg0: i32, %arg1: i32, %arg2: memref<1x128x128xbf16, #tpu.memory_space<vmem>>, %arg3: memref<128x128xbf16, #tpu.memory_space<vmem>>, %arg4: memref<1x128x128xbf16, #tpu.memory_space<vmem>>) attributes {dimension_semantics = [#tpu.dimension_semantics<parallel>, #tpu.dimension_semantics<parallel>], iteration_bounds = array<i64: 2, 1>, scalar_prefetch = 0 : i64, scratch_operands = 0 : i64, tpu.core_type = #tpu.core_type<tc>, window_params = [{transform_indices = @transform_0, window_bounds = array<i64: 1, 128, 128>}, {pipeline_mode = #tpu.pipeline_mode<synchronous>, transform_indices = @transform_1, window_bounds = array<i64: 128, 128>}, {transform_indices = @transform_2, window_bounds = array<i64: 1, 128, 128>}]} {
    %c0 = arith.constant 0 : index
    %c0_0 = arith.constant 0 : index
    %c0_1 = arith.constant 0 : index
    %0 = vector.load %arg2[%c0, %c0_0, %c0_1] : memref<1x128x128xbf16, #tpu.memory_space<vmem>>, vector<1x128x128xbf16>
    %1 = vector.shape_cast %0 : vector<1x128x128xbf16> to vector<128x128xbf16>
    %c0_2 = arith.constant 0 : index
    %c0_3 = arith.constant 0 : index
    %2 = vector.load %arg3[%c0_2, %c0_3] : memref<128x128xbf16, #tpu.memory_space<vmem>>, vector<128x128xbf16>
    %cst = arith.constant dense<0.000000e+00> : vector<128x128xf32>
    %3 = tpu.matmul %1, %2, %cst {dimension_numbers = #tpu.dot_dimension_numbers<[1], [0], [0], [1], [0, 0, 1, 1], [], []>} : vector<128x128xbf16>, vector<128x128xbf16>, vector<128x128xf32> -> vector<128x128xf32>
    %4 = arith.truncf %3 : vector<128x128xf32> to vector<128x128xbf16>
    %c0_4 = arith.constant 0 : index
    %c0_5 = arith.constant 0 : index
    %c0_6 = arith.constant 0 : index
    %5 = vector.load %arg4[%c0_4, %c0_5, %c0_6] : memref<1x128x128xbf16, #tpu.memory_space<vmem>>, vector<1x128x128xbf16>
    %6 = vector.shape_cast %5 : vector<1x128x128xbf16> to vector<128x128xbf16>
    %7 = vector.shape_cast %4 : vector<128x128xbf16> to vector<1x128x128xbf16>
    tpu.vector_store %arg4[%c0_4, %c0_5, %c0_6], %7 {strides = array<i32>} : memref<1x128x128xbf16, #tpu.memory_space<vmem>>, vector<1x128x128xbf16>,
    return
  }
  func.func @transform_0(%arg0: i32, %arg1: i32) -> (i32, i32, i32) {
    %c0_i32 = arith.constant 0 : i32
    %c0_i32_0 = arith.constant 0 : i32
    return %arg0, %arg1, %c0_i32 : i32, i32, i32
  }
  func.func @transform_1(%arg0: i32, %arg1: i32) -> (i32, i32) {
    %c0_i32 = arith.constant 0 : i32
    %c0_i32_0 = arith.constant 0 : i32
    %c0_i32_1 = arith.constant 0 : i32
    return %c0_i32, %c0_i32_0 : i32, i32
  }
  func.func @transform_2(%arg0: i32, %arg1: i32) -> (i32, i32, i32) {
    %c0_i32 = arith.constant 0 : i32
    %c0_i32_0 = arith.constant 0 : i32
    return %arg0, %arg1, %c0_i32 : i32, i32, i32
  }
}

</mosaic_0001>

<bundles_post_ra>
// kernel: tpu_custom_call.1
= control target key start
LH: loop header
LB: loop body
LE: loop exit
PB: predicated region body
PF: predicated region fallthrough
CT: control target
= control target key end

     0   :  { %7 = vsyncpa [#allocation3], 0  ;;  %s1294_s0 = inlined_call_operand.hbm [shape: bf16[2,128,128], index: 0, kind: input, shape index: {}]   ;;  %s1295_s1 = inlined_call_operand.hbm [shape: bf16[128,128], index: 1, kind: input, shape index: {}]   ;;  %s1296_s2 = inlined_call_operand.hbm [shape: bf16[2,128,128], index: 2, kind: output, shape index: {}]  }
   0x1   :  { %9 = vsyncpa [#allocation3 + $0x1], 0 }
   0x2   :  { %10 = vsyncpa [#allocation6], 0 }
   0x3   :  { %11 = vsyncpa [#allocation4], 0 }
   0x4   :  { %13 = vsyncpa [#allocation4 + $0x1], 0  ;;  %s1055_s9 = smov 0   ;;  %s1057_s10 = smov 0  }
   0x5   :  { %s1059_s11 = smov 0   ;;  %s1061_s12 = smov 0  }
   0x6   :  { %s1063_s13 = smov 0   ;;  %s1065_s14 = smov 0  }
   0x7 LB: > { %s616_s15 = sadd.s32 4294967295, %s1031_s14   ;;  %s617_s16 = sadd.s32 4294967294, %s1031_s14   ;;  %s1031_s14 = sphi %s1065_s14, %s19_s14   ;;  %s1027_s13 = sphi %s1063_s13, %s1320_s13   ;;  %s1023_s12 = sphi %s1061_s12, %s1319_s12   ;;  %s1019_s11 = sphi %s1059_s11, %s1318_s11   ;;  %s1015_s10 = sphi %s1057_s10, %s1317_s10   ;;  %s1011_s9 = sphi %s1055_s9, %s1316_s9  }
   0x8   : > { %p53_p0 = scmp.ne.s32.totalorder %s1015_s10, %s1011_s9  ;;  %p1089_p1 = scmp.eq.s32.totalorder %s616_s15, 0 }
   0x9   : > { %p1093_p2 = scmp.eq.s32.totalorder %s616_s15, 1  ;;  %p106_p3 = scmp.eq.s32.totalorder %s617_s16, 1 }
   0xa   : > { %s1301_s17 = scalar_select %p1089_p1, 1, 0 }
   0xb   : > { %s1302_s18 = scalar_select %p1093_p2, 1, 0 }
   0xc   : > { %p1099_p4 = por %p1089_p1, %p53_p0  ;;  %p618_p5 = scmp.ge.s32.totalorder %s1031_s14, 1 }
   0xd   : > { %p1104_p6 = por %p106_p3, %p53_p0  ;;  %p113_p7 = scmp.lt.s32.totalorder %s1031_s14, 3 }
   0xe   : > { %s1303_s19 = scalar_select %p1099_p4, 1, 0 }
   0xf   : > { %s1304_s20 = scalar_select %p1104_p6, 1, 0 }
  0x10   : > { %p1109_p8 = pnand %p618_p5, %p113_p7  ;;  %s1033_s22 = smov [#allocation5]  }
  0x11   : > { %s125_s23 = sshll.u32 %s1033_s22, 4  ;;  %s31_s25 = sadd.s32 1, %s1027_s13  ;;  %s126_s23 = int_to_ptr.vmem [resolvable:$true] %s125_s23 }
  0x12   : > { %s1305_s21 = scalar_select %p1109_p8, 1, 0 }
  0x13   : > { %p802_p9 = pneg %p1109_p8  ;;  %s887_s28 = scalar_lea.hbm %s1295_s1, 1024 }
  0x14   : > { %p888_p12 = scmp.ne.s32.totalorder %s1295_s1, %s887_s28  ;;  %p894_p5 = scmp.lt.u32.totalorder %s887_s28, %s1295_s1 }
  0x15   : > { %p1118_p11 = pnand %p802_p9, %p1089_p1 }
  0x17   : > { %p889_p13 = pneg %p1118_p11 }
  0x19   : > { %p890_p0 = pnand %p889_p13, %p888_p12 }
  0x1b   : > { %p891_p3 = pneg %p890_p0 }
  0x1d   : > { %p896_p7 = pnand %p894_p5, %p891_p3 }
  0x1f   : > { %899 = shalt.err (!%p896_p7)
}
  0x20   : > { %s900_s5 = scalar_lea.vmem %s126_s23, 1024  ;;  %p908_p1 = scmp.lt.s32.totalorder %s126_s23, %s126_s23 }
  0x21   : > { %p901_p9 = scmp.ne.s32.totalorder %s126_s23, %s900_s5  ;;  %p909_p4 = scmp.lt.s32.totalorder %s900_s5, %s900_s5 }
  0x23   : > { %p903_p10 = pnand %p901_p9, %p889_p13  ;;  %p910_p8 = por %p909_p4, %p908_p1 }
  0x25   : > { %p904_p6 = pneg %p903_p10 }
  0x27   : > { %p911_p2 = pnand %p910_p8, %p904_p6 }
  0x29   : > { %914 = shalt.err (!%p911_p2)
}
  0x2a   : > { %s1034_s6 = smov 64   ;;  %s1035_s7 = smov 4  }
  0x2b   : > { %805 = dma.hbm_to_vmem [thread:$0]  (!%p1118_p11), %s1295_s1, 1024, %s126_s23, [#allocation6], %s1034_s6, %s1034_s6, %s1035_s7  }
  0x2c   : > { %p33_p1 = scmp.ge.s32.totalorder %s31_s25, 2  ;;  %s40_s16 = sadd.s32 1, %s1019_s11 }
  0x2d   : > { %p47_p2 = scmp.ne.s32.totalorder %s1019_s11, %s1015_s10  ;;  %p48_p4 = scmp.eq.s32.totalorder %s1031_s14, 0 }
  0x2e   : > { %s1322_s25 = smov (%p33_p1, %s31_s25), 0  ;;  %p1308_p8 = scmp.ne.s32.totalorder %s1302_s18, 0 }
  0x2f   : > { %p1148_p6 = por %p48_p4, %p47_p2  ;;  %s35_s26 = ssub.s32 %s1027_s13, %s1322_s25 }
  0x30   : > { %p1154_p10 = por %p1308_p8, %p47_p2  ;;  %p815_p12 = scmp.lt.s32.totalorder %s1031_s14, 2 }
  0x31   : > { %p38_p11 = scmp.eq.s32.totalorder %s35_s26, 0  ;;  %s139_s23 = sand.u32 1, %s1019_s11  }
  0x32   : > { %s621_s27 = sshll.u32 %s139_s23, 6  ;;  %s665_s29 = sshll.u32 %s1027_s13, 10 }
  0x33   : > { %s1163_s28 = scalar_select %p38_p11, %s1019_s11, %s40_s16  }
  0x34   : > { %s1169_s4 = scalar_lea.hbm %s1294_s0, %s665_s29  ;;  %s143_s18 = scalar_lea.vmem [#allocation2], %s621_s27 }
  0x35   : > { %s152_s5 = sshll.u32 %s143_s18, 4  ;;  %p1175_p13 = pnand %p815_p12, %p1148_p6  ;;  %s1171_s5 = int_to_ptr.vmem [resolvable:$true] %s152_s5 }
  0x36   : > { %s1179_s15 = scalar_lea.sflag [#allocation3], %s139_s23  ;;  %s915_s16 = scalar_lea.hbm %s1169_s4, 1024 }
  0x37   : > { %p916_p0 = scmp.ne.s32.totalorder %s1169_s4, %s915_s16  ;;  %p917_p3 = pneg %p1175_p13 }
  0x38   : > { %s920_s22 = scalar_lea.hbm %s1294_s0, 2048  ;;  %p921_p9 = scmp.lt.u32.totalorder %s1169_s4, %s1294_s0 }
  0x39   : > { %p918_p5 = pnand %p917_p3, %p916_p0  ;;  %p922_p1 = scmp.lt.u32.totalorder %s920_s22, %s915_s16 }
  0x3a   : > { %p924_p4 = scmp.lt.u32.totalorder %s915_s16, %s1169_s4 }
  0x3b   : > { %p919_p7 = pneg %p918_p5  ;;  %p923_p2 = por %p922_p1, %p921_p9 }
  0x3d   : > { %p925_p6 = por %p924_p4, %p923_p2 }
  0x3f   : > { %p926_p8 = pnand %p925_p6, %p919_p7 }
  0x41   : > { %929 = shalt.err (!%p926_p8)
}
  0x42   : > { %s930_s23 = scalar_lea.vmem %s1171_s5, 1024  ;;  %s1036_s3 = smov [#allocation2]  }
  0x43   : > { %p931_p12 = scmp.ne.s32.totalorder %s1171_s5, %s930_s23  ;;  %s935_s18 = sshll.u32 %s1036_s3, 4  ;;  %s936_s18 = int_to_ptr.vmem [resolvable:$false] %s935_s18 }
  0x44   : > { %s937_s26 = scalar_lea.vmem %s936_s18, 2048  ;;  %p938_p5 = scmp.lt.s32.totalorder %s1171_s5, %s936_s18 }
  0x45   : > { %p933_p11 = pnand %p931_p12, %p917_p3  ;;  %p939_p9 = scmp.lt.s32.totalorder %s937_s26, %s930_s23 }
  0x47   : > { %p934_p0 = pneg %p933_p11  ;;  %p940_p1 = por %p939_p9, %p938_p5 }
  0x49   : > { %p941_p2 = pnand %p940_p1, %p934_p0 }
  0x4b   : > { %944 = shalt.err (!%p941_p2)
}
  0x4c   : > { %809 = dma.hbm_to_vmem [thread:$0]  (!%p1175_p13), %s1169_s4, 1024, %s1171_s5, %s1179_s15, %s1034_s6, %s1034_s6, %s1035_s7  }
  0x4d   : > { %p1311_p3 = scmp.ne.s32.totalorder %s1305_s21, 0 }
  0x4e   : > { %s1213_s16 = sand.u32 (!%p1311_p3), 1, %s1015_s10   ;;  %p1312_p7 = scmp.ne.s32.totalorder (!%p1311_p3), %s1303_s19, 0 }
  0x4f   : > { %164 = sbr.rel (%p1311_p3) target bundleno = 363 (0x16b), region = 28  ;;  %s625_s27 = sshll.u32 (!%p1311_p3), %s1213_s16, 6 }
  0x50   : > { %s167_s22 = scalar_lea.sflag (!%p1311_p3), [#allocation3], %s1213_s16  ;;  %s1219_s8 = scalar_lea.vmem (!%p1311_p3), [#allocation2], %s625_s27 }
  0x56   : > { %998 = dma.done.wait (%p1312_p7), %s167_s22, 1024  }
  0x57   : > { %1000 = vsyncadd (%p1312_p7), %s167_s22, 4294966272  ;;  %p1313_p13 = scmp.ne.s32.totalorder %s1301_s17, 0 }
  0x59   : > { %1002 = dma.done.wait (%p1313_p13), [#allocation6], 1024  }
  0x5a   : > { %1004 = vsyncadd (%p1313_p13), [#allocation6], 4294966272  ;;  %v871_v0 = vld [vmem:[#allocation5] sm:$0xff]   ;;  %v872_v1 = vld [vmem:[#allocation5 + $0x8] sm:$0xff]   ;;  %s194_s17 = scalar_lea.vmem [#allocation7], %s625_s27  ;;  %s682_s21 = sshll.u32 %s1023_s12, 10 }
  0x5b   : > { %746 = vmatprep.subr.bf16.mxu0 %v871_v0  ;;  %778 = vmatprep.subr.bf16.mxu1 %v871_v0  ;;  %v873_v2 = vld [vmem:[#allocation5 + $0x10] sm:$0xff]   ;;  %v874_v3 = vld [vmem:[#allocation5 + $0x18] sm:$0xff]   ;;  %v879_v4 = vld [vmem:[%s1219_s8] sm:$0xff]   ;;  %s519_s19 = sshll.u32 %s194_s17, 4  ;;  %s1245_s4 = scalar_lea.hbm %s1296_s2, %s682_s21  ;;  %s1240_s19 = int_to_ptr.vmem [resolvable:$true] %s519_s19 }
  0x5c   : > { %747 = vmatpush3.bf16.msra.mxu0 %v871_v0  ;;  %786 = vmatpush3.bf16.msra.mxu1 %v871_v0  ;;  %v880_v5 = vld [vmem:[%s1219_s8 + $0x20] sm:$0xff]   ;;  %v876_v7 = vld [vmem:[#allocation5 + $0x28] sm:$0xff]   ;;  %v877_v8 = vld [vmem:[#allocation5 + $0x30] sm:$0xff]   ;;  %s504_s12 = scalar_lea.sflag [#allocation4], %s1213_s16  ;;  %s945_s5 = scalar_lea.vmem %s1240_s19, 1024 }
  0x5d   : > { %748 = vmatprep.subr.bf16.mxu0 %v872_v1  ;;  %779 = vmatprep.subr.bf16.mxu1 %v872_v1  ;;  %v875_v6 = vld [vmem:[#allocation5 + $0x20] sm:$0xff]   ;;  %v878_v9 = vld [vmem:[#allocation5 + $0x38] sm:$0xff]   ;;  %v881_v10 = vld [vmem:[%s1219_s8 + $0x8] sm:$0xff]   ;;  %p946_p4 = scmp.ne.s32.totalorder %s1240_s19, %s945_s5  ;;  %s1037_s15 = smov [#allocation7]  }
  0x5e   : > { %762 = vmatprep.mubr.bf16.mxu0 %v879_v4  ;;  %770 = vmatprep.mubr.bf16.mxu1 %v880_v5  ;;  %v882_v11 = vld [vmem:[%s1219_s8 + $0x28] sm:$0xff]   ;;  %v883_v12 = vld [vmem:[%s1219_s8 + $0x10] sm:$0xff]   ;;  %v885_v14 = vld [vmem:[%s1219_s8 + $0x18] sm:$0xff]   ;;  %s949_s29 = sshll.u32 %s1037_s15, 4  ;;  %s950_s29 = int_to_ptr.vmem [resolvable:$false] %s949_s29 }
  0x5f   : > { %v884_v13 = vld [vmem:[%s1219_s8 + $0x30] sm:$0xff]   ;;  %v886_v15 = vld [vmem:[%s1219_s8 + $0x38] sm:$0xff]   ;;  %p947_p6 = pnand %p946_p4, %p1154_p10  ;;  %s951_s30 = scalar_lea.vmem %s950_s29, 2048 }
  0x60   : > { %749 = vmatpush3.bf16.msra.mxu0 %v872_v1  ;;  %787 = vmatpush3.bf16.msra.mxu1 %v872_v1  ;;  %p952_p12 = scmp.lt.s32.totalorder %s1240_s19, %s950_s29  ;;  %p953_p11 = scmp.lt.s32.totalorder %s951_s30, %s945_s5 }
  0x61   : > { %750 = vmatprep.subr.bf16.mxu0 %v873_v2  ;;  %780 = vmatprep.subr.bf16.mxu1 %v873_v2  ;;  %p948_p8 = pneg %p947_p6 }
  0x62   : > { %p954_p0 = por %p953_p11, %p952_p12 }
  0x64   : > { %751 = vmatpush3.bf16.msra.mxu0 %v873_v2  ;;  %788 = vmatpush3.bf16.msra.mxu1 %v873_v2  ;;  %p955_p5 = pnand %p954_p0, %p948_p8 }
  0x65   : > { %752 = vmatprep.subr.bf16.mxu0 %v874_v3  ;;  %781 = vmatprep.subr.bf16.mxu1 %v874_v3 }
  0x68   : > { %753 = vmatpush3.bf16.msra.mxu0 %v874_v3  ;;  %789 = vmatpush3.bf16.msra.mxu1 %v874_v3 }
  0x69   : > { %754 = vmatprep.subr.bf16.mxu0 %v875_v6  ;;  %782 = vmatprep.subr.bf16.mxu1 %v875_v6 }
  0x6c   : > { %755 = vmatpush3.bf16.msra.mxu0 %v875_v6  ;;  %790 = vmatpush3.bf16.msra.mxu1 %v875_v6 }
  0x6d   : > { %756 = vmatprep.subr.bf16.mxu0 %v876_v7  ;;  %783 = vmatprep.subr.bf16.mxu1 %v876_v7 }
  0x70   : > { %757 = vmatpush3.bf16.msra.mxu0 %v876_v7  ;;  %791 = vmatpush3.bf16.msra.mxu1 %v876_v7 }
  0x71   : > { %758 = vmatprep.subr.bf16.mxu0 %v877_v8  ;;  %784 = vmatprep.subr.bf16.mxu1 %v877_v8 }
  0x74   : > { %759 = vmatpush3.bf16.msra.mxu0 %v877_v8  ;;  %792 = vmatpush3.bf16.msra.mxu1 %v877_v8 }
  0x75   : > { %760 = vmatprep.subr.bf16.mxu0 %v878_v9  ;;  %785 = vmatprep.subr.bf16.mxu1 %v878_v9 }
  0x78   : > { %761 = vmatpush3.bf16.msra.mxu0 %v878_v9  ;;  %793 = vmatpush3.bf16.msra.mxu1 %v878_v9 }
  0x7b   : > { %763 = vmatmul.mubr.bf16.vlgmr.msra.gmra.mrb[0].mxu0 %v881_v10  ;;  %771 = vmatmul.mubr.bf16.vlgmr.msra.gmra.mrb[0].mxu1 %v882_v11 }
  0x7c   : > { %766 = vmatprep.mubr.bf16.mxu0 %v883_v12  ;;  %774 = vmatprep.mubr.bf16.mxu1 %v884_v13 }
  0x83   : > { %767 = vmatmul.mubr.bf16.gmra.mrb[4].mxu0 %v885_v14  ;;  %775 = vmatmul.mubr.bf16.gmra.mrb[4].mxu1 %v886_v15 }
 0x14e   : > { %v764_v16 = vpop.f32.mrb[0].mxu0  ;;  %v772_v17 = vpop.f32.mrb[0].mxu1 }
 0x14f   : > { %v360_v18 = vpop.f32.mrb[1].mxu0  ;;  %v392_v19 = vpop.f32.mrb[1].mxu1 }
 0x150   : > { %v765_v20 = vpop.f32.mrb[2].mxu0  ;;  %v773_v21 = vpop.f32.mrb[2].mxu1 }
 0x151   : > { %v691_v22 = vpack.c.bf16 %v765_v20, %v764_v16  ;;  %v711_v23 = vpack.c.bf16 %v773_v21, %v772_v17  ;;  %v363_v24 = vpop.f32.mrb[3].mxu0  ;;  %v395_v25 = vpop.f32.mrb[3].mxu1 }
 0x152   : > { %v686_v26 = vpack.c.bf16 %v363_v24, %v360_v18  ;;  %v706_v27 = vpack.c.bf16 %v395_v25, %v392_v19 }
 0x153   : > { %723 = vst [vmem:[%s194_s17 + $0x8] sm:$0xff] %v691_v22   ;;  %727 = vst [vmem:[%s194_s17 + $0x28] sm:$0xff] %v711_v23  }
 0x154   : > { %687 = vst [vmem:[%s194_s17] sm:$0xff] %v686_v26   ;;  %726 = vst [vmem:[%s194_s17 + $0x20] sm:$0xff] %v706_v27  }
 0x156   : > { %v768_v28 = vpop.f32.mrb[4].mxu0  ;;  %v776_v29 = vpop.f32.mrb[4].mxu1 }
 0x157   : > { %v376_v30 = vpop.f32.mrb[5].mxu0  ;;  %v408_v31 = vpop.f32.mrb[5].mxu1 }
 0x158   : > { %v769_v32 = vpop.f32.mrb[6].mxu0  ;;  %v777_v33 = vpop.f32.mrb[6].mxu1 }
 0x159   : > { %v701_v34 = vpack.c.bf16 %v769_v32, %v768_v28  ;;  %v721_v35 = vpack.c.bf16 %v777_v33, %v776_v29  ;;  %v379_v36 = vpop.f32.mrb[7].mxu0  ;;  %v411_v37 = vpop.f32.mrb[7].mxu1 }
 0x15a   : > { %v696_v38 = vpack.c.bf16 %v379_v36, %v376_v30  ;;  %v716_v39 = vpack.c.bf16 %v411_v37, %v408_v31 }
 0x15b   : > { %725 = vst [vmem:[%s194_s17 + $0x18] sm:$0xff] %v701_v34   ;;  %729 = vst [vmem:[%s194_s17 + $0x38] sm:$0xff] %v721_v35  }
 0x15c   : > { %724 = vst [vmem:[%s194_s17 + $0x10] sm:$0xff] %v696_v38   ;;  %728 = vst [vmem:[%s194_s17 + $0x30] sm:$0xff] %v716_v39  }
 0x15d   : > { %958 = shalt.err (!%p955_p5)
}
 0x15e   : > { %s959_s23 = scalar_lea.hbm %s1245_s4, 1024  ;;  %s963_s26 = scalar_lea.hbm %s1296_s2, 2048 }
 0x15f   : > { %p960_p9 = scmp.ne.s32.totalorder %s1245_s4, %s959_s23  ;;  %p964_p3 = scmp.lt.u32.totalorder %s1245_s4, %s1296_s2 }
 0x160   : > { %p965_p7 = scmp.lt.u32.totalorder %s963_s26, %s959_s23  ;;  %p967_p4 = scmp.lt.u32.totalorder %s959_s23, %s1245_s4 }
 0x161   : > { %p961_p1 = pnand %p960_p9, %p1154_p10 }
 0x162   : > { %p966_p13 = por %p965_p7, %p964_p3 }
 0x163   : > { %p962_p2 = pneg %p961_p1 }
 0x164   : > { %p968_p6 = por %p967_p4, %p966_p13 }
 0x166   : > { %p969_p8 = pnand %p968_p6, %p962_p2 }
 0x168   : > { %972 = shalt.err (!%p969_p8)
}
 0x169   : > { %s1038_s8 = smov 64   ;;  %s1039_s17 = smov 4  }
 0x16a   : > { %800 = dma.vmem_to_hbm [thread:$0]  (%p1154_p10), %s1240_s19, 1024, %s1245_s4, %s504_s12, %s1038_s8, %s1038_s8, %s1039_s17  }
 0x16b PF: > { %s534_s21 = sand.u32 1, %s1011_s9   ;;  %p1314_p12 = scmp.ne.s32.totalorder %s1304_s20, 0 }
 0x16c   : > { %p1315_p11 = scmp.ge.s32.totalorder %s1031_s14, 2  ;;  %s535_s6 = scalar_lea.sflag [#allocation4], %s534_s21 }
 0x16e   : > { %p811_p0 = pnand %p1315_p11, %p1314_p12 }
 0x170   : > { %1006 = dma.done.wait (!%p811_p0), %s535_s6, 1024  }
 0x171   : > { %1008 = vsyncadd (!%p811_p0), %s535_s6, 4294966272  ;;  %s19_s14 = sadd.s32 1, %s1031_s14   ;;  %s1316_s9 = smov %s1015_s10 }
 0x172   : > { %p16_p5 = scmp.ge.s32.totalorder %s19_s14, 4   ;;  %s1317_s10 = smov %s1019_s11 }
 0x173   : > { %s1318_s11 = smov %s1163_s28  ;;  %s1319_s12 = smov %s1027_s13 }
 0x174   : > { %s1320_s13 = smov %s1322_s25  ;;  %18 = sbr.rel (!%p16_p5) target bundleno = 7 (0x7), region = 77 }
 0x17b   :  { %540 = vsyncpa [#allocation3], 1 }
 0x17c   :  { %542 = vsyncpa [#allocation3 + $0x1], 1 }
 0x17d   :  { %543 = vsyncpa [#allocation6], 1 }
 0x17e   :  { %544 = vsyncpa [#allocation4], 1 }
 0x17f   :  { %546 = vsyncpa [#allocation4 + $0x1], 1 }

</bundles_post_ra>
